<compile_context>
chip_gen: v7x
topology: tpu7x:2x2x1
jax: 0.10.0
libtpu: 0.0.40
codegen_flags: <defaults>
</compile_context>

<pallas_src>
import jax
import jax.numpy as jnp
from jax.experimental import pallas as pl
from jax.experimental.pallas import tpu as pltpu


def _round_up(x: int, m: int) -> int:
    return ((x + m - 1) // m) * m


def _linear_kernel_f32_out(x_ref, w_ref, b_ref, o_ref):
    # x_ref: (tm, tk) bf16   w_ref: (tk, tn) bf16 (pre-transposed W^T)
    # b_ref: (1, tn) f32     o_ref: (tm, tn) f32 — doubles as the accumulator.
    k = pl.program_id(2)

    @pl.when(k == 0)
    def _():
        o_ref[...] = jnp.zeros_like(o_ref)

    o_ref[...] += jnp.dot(x_ref[...], w_ref[...],
                          preferred_element_type=jnp.float32)

    @pl.when(k == pl.num_programs(2) - 1)
    def _():
        o_ref[...] += b_ref[...]


def _linear_kernel_acc(x_ref, w_ref, b_ref, o_ref, acc_ref):
    # Low-precision output path: accumulate in f32 scratch, cast at the end.
    k = pl.program_id(2)

    @pl.when(k == 0)
    def _():
        acc_ref[...] = jnp.zeros_like(acc_ref)

    acc_ref[...] += jnp.dot(x_ref[...], w_ref[...],
                            preferred_element_type=jnp.float32)

    @pl.when(k == pl.num_programs(2) - 1)
    def _():
        o_ref[...] = (acc_ref[...] + b_ref[...]).astype(o_ref.dtype)


def _pick_config():
    """Generation-aware (tm, tn, tk, scoped-VMEM) selection."""
    vmem_cap = None
    try:
        vmem_cap = getattr(pltpu.get_tpu_info(), "vmem_capacity_bytes", None)
    except Exception:
        vmem_cap = None
    if vmem_cap is not None and vmem_cap >= 100 * 1024 * 1024:
        # v5e / v6e: 128 MiB physical VMEM — big output tiles cut HBM re-reads.
        return 1024, 1024, 1024, 64 * 1024 * 1024
    # v7x (64 MiB per TensorCore) or unknown: moderate tiles, ~48 MiB scoped cap.
    return 512, 512, 1024, 48 * 1024 * 1024


def linear_forward(x, weight, bias, *, compute_dtype=jnp.bfloat16):
    """y = x @ weight.T + bias  (matches torch nn.Linear forward)."""
    n, f_in = x.shape
    f_out = weight.shape[0]
    out_dtype = x.dtype

    tm, tn, tk, vmem_limit = _pick_config()

    # Clamp tiles to the alignment-padded problem; keep (8,128) alignment and
    # lane-dense (>=128-wide) output stores.
    tm = min(tm, _round_up(n, 8))
    tn = min(tn, _round_up(f_out, 128))
    tk = min(tk, _round_up(f_in, 128))

    # v7x megacore: if everything fits a single (tm, tn) tile, split M (or N) so
    # a 'parallel' grid axis has >=2 blocks (no-op on single-core v5e/v6e).
    if _round_up(n, tm) == tm and _round_up(f_out, tn) == tn:
        if tm % 16 == 0:
            tm //= 2
        elif tn % 256 == 0:
            tn //= 2

    n_p = _round_up(n, tm)
    f_out_p = _round_up(f_out, tn)
    f_in_p = _round_up(f_in, tk)

    # bf16 operands (f32 accumulation) — native MXU dtype on v5e/v6e/v7x.
    op_dtype = compute_dtype if compute_dtype is not None else x.dtype

    # Pad only when needed; only the K axis truly needs zeros for correctness,
    # padded M/N rows/cols are sliced off below.
    x_p = x.astype(op_dtype)
    if (n_p, f_in_p) != (n, f_in):
        x_p = jnp.pad(x_p, ((0, n_p - n), (0, f_in_p - f_in)))

    # Transpose W once (one HBM pass, fused with the cast/pad) so the kernel's
    # contraction is the MXU fast path with no per-tile XLU transpose.
    # TODO(synk): in a real model, pad/transpose/cast the weight once at
    # parameter-setup time instead of on every forward call.
    w_t = weight.T.astype(op_dtype)                     # (F_in, F_out)
    if (f_in_p, f_out_p) != (f_in, f_out):
        w_t = jnp.pad(w_t, ((0, f_in_p - f_in), (0, f_out_p - f_out)))

    b_p = bias.astype(jnp.float32)
    if f_out_p != f_out:
        b_p = jnp.pad(b_p, (0, f_out_p - f_out))
    b_p = b_p.reshape(1, f_out_p)

    grid = (n_p // tm, f_out_p // tn, f_in_p // tk)

    use_acc_scratch = out_dtype != jnp.float32
    kernel = _linear_kernel_acc if use_acc_scratch else _linear_kernel_f32_out
    scratch_shapes = ([pltpu.VMEM((tm, tn), jnp.float32)]
                      if use_acc_scratch else [])

    out = pl.pallas_call(
        kernel,
        out_shape=jax.ShapeDtypeStruct((n_p, f_out_p), out_dtype),
        grid_spec=pltpu.PrefetchScalarGridSpec(
            num_scalar_prefetch=0,
            grid=grid,
            in_specs=[
                pl.BlockSpec((tm, tk), lambda i, j, k: (i, k)),   # x tile
                pl.BlockSpec((tk, tn), lambda i, j, k: (k, j)),   # W^T tile
                pl.BlockSpec((1, tn), lambda i, j, k: (0, j)),    # bias tile
            ],
            out_specs=pl.BlockSpec((tm, tn), lambda i, j, k: (i, j)),
            scratch_shapes=scratch_shapes,
        ),
        compiler_params=pltpu.CompilerParams(
            dimension_semantics=("parallel", "parallel", "arbitrary"),
            vmem_limit_bytes=vmem_limit,
        ),
    )(x_p, w_t, b_p)

    if (n_p, f_out_p) != (n, f_out):
        out = out[:n, :f_out]
    return out


if __name__ == "__main__":
    key = jax.random.PRNGKey(0)
    n_samples, n_features = 8, 32   # input_size = output_size = n_features

    kx, kw, kb = jax.random.split(key, 3)
    x = jax.random.normal(kx, (n_samples, n_features), dtype=jnp.float32)
    # Deterministic nn.Linear-style init: U(-1/sqrt(fan_in), 1/sqrt(fan_in))
    bound = 1.0 / jnp.sqrt(n_features)
    weight = jax.random.uniform(kw, (n_features, n_features),
                                minval=-bound, maxval=bound, dtype=jnp.float32)
    bias = jax.random.uniform(kb, (n_features,),
                              minval=-bound, maxval=bound, dtype=jnp.float32)

    y = linear_forward(x, weight, bias)
    jax.block_until_ready(y)

    # Reference with matching bf16 operand rounding (f32 accumulation), plus a
    # looser sanity check against the pure-f32 result.
    y_ref_bf16 = jnp.dot(x.astype(jnp.bfloat16), weight.astype(jnp.bfloat16).T,
                         preferred_element_type=jnp.float32) + bias
    y_ref_f32 = x @ weight.T + bias
    assert y.shape == y_ref_f32.shape and y.dtype == y_ref_f32.dtype
    assert jnp.allclose(y, y_ref_bf16, atol=1e-2, rtol=1e-2)
    assert jnp.allclose(y, y_ref_f32, atol=5e-2, rtol=5e-2)
    print("KERNEL_OK")
</pallas_src>

<mosaic_0001>
module attributes {stable_mosaic.version = 11 : i64} {
  func.func @_linear_kernel_f32_out(%arg0: i32, %arg1: i32, %arg2: i32, %arg3: memref<8x128xbf16, #tpu.memory_space<vmem>>, %arg4: memref<128x128xbf16, #tpu.memory_space<vmem>>, %arg5: memref<1x128xf32, #tpu.memory_space<vmem>>, %arg6: memref<8x128xf32, #tpu.memory_space<vmem>>) attributes {dimension_semantics = [#tpu.dimension_semantics<parallel>, #tpu.dimension_semantics<parallel>, #tpu.dimension_semantics<arbitrary>], iteration_bounds = array<i64: 1, 1, 1>, scalar_prefetch = 0 : i64, scratch_operands = 0 : i64, tpu.core_type = #tpu.core_type<tc>, window_params = [{transform_indices = @transform_0, window_bounds = array<i64: 8, 128>}, {transform_indices = @transform_1, window_bounds = array<i64: 128, 128>}, {transform_indices = @transform_2, window_bounds = array<i64: 1, 128>}, {transform_indices = @transform_3, window_bounds = array<i64: 8, 128>}]} {
    %c0_i32 = arith.constant 0 : i32
    %0 = arith.cmpi eq, %arg2, %c0_i32 : i32
    %1 = arith.extui %0 : i1 to i32
    %c0_i32_0 = arith.constant 0 : i32
    %2 = arith.cmpi ne, %1, %c0_i32_0 : i32
    scf.if %2 {
      %cst_10 = arith.constant 0.000000e+00 : f32
      %12 = vector.broadcast %cst_10 : f32 to vector<8x128xf32>
      %c0_11 = arith.constant 0 : index
      %c0_12 = arith.constant 0 : index
      %13 = vector.load %arg6[%c0_11, %c0_12] : memref<8x128xf32, #tpu.memory_space<vmem>>, vector<8x128xf32>
      tpu.vector_store %arg6[%c0_11, %c0_12], %12 {strides = array<i32>} : memref<8x128xf32, #tpu.memory_space<vmem>>, vector<8x128xf32>,
    } else {
    }
    %c0 = arith.constant 0 : index
    %c0_1 = arith.constant 0 : index
    %3 = vector.load %arg6[%c0, %c0_1] : memref<8x128xf32, #tpu.memory_space<vmem>>, vector<8x128xf32>
    %c0_2 = arith.constant 0 : index
    %c0_3 = arith.constant 0 : index
    %4 = vector.load %arg3[%c0_2, %c0_3] : memref<8x128xbf16, #tpu.memory_space<vmem>>, vector<8x128xbf16>
    %c0_4 = arith.constant 0 : index
    %c0_5 = arith.constant 0 : index
    %5 = vector.load %arg4[%c0_4, %c0_5] : memref<128x128xbf16, #tpu.memory_space<vmem>>, vector<128x128xbf16>
    %cst = arith.constant dense<0.000000e+00> : vector<8x128xf32>
    %6 = tpu.matmul %4, %5, %cst {dimension_numbers = #tpu.dot_dimension_numbers<[1], [0], [0], [1], [0, 0, 1, 1], [], []>} : vector<8x128xbf16>, vector<128x128xbf16>, vector<8x128xf32> -> vector<8x128xf32>
    %7 = arith.addf %3, %6 : vector<8x128xf32>
    %c0_6 = arith.constant 0 : index
    %c0_7 = arith.constant 0 : index
    %8 = vector.load %arg6[%c0_6, %c0_7] : memref<8x128xf32, #tpu.memory_space<vmem>>, vector<8x128xf32>
    tpu.vector_store %arg6[%c0_6, %c0_7], %7 {strides = array<i32>} : memref<8x128xf32, #tpu.memory_space<vmem>>, vector<8x128xf32>,
    %c0_i32_8 = arith.constant 0 : i32
    %9 = arith.cmpi eq, %arg2, %c0_i32_8 : i32
    %10 = arith.extui %9 : i1 to i32
    %c0_i32_9 = arith.constant 0 : i32
    %11 = arith.cmpi ne, %10, %c0_i32_9 : i32
    scf.if %11 {
      %c0_10 = arith.constant 0 : index
      %c0_11 = arith.constant 0 : index
      %12 = vector.load %arg6[%c0_10, %c0_11] : memref<8x128xf32, #tpu.memory_space<vmem>>, vector<8x128xf32>
      %c0_12 = arith.constant 0 : index
      %c0_13 = arith.constant 0 : index
      %13 = vector.load %arg5[%c0_12, %c0_13] : memref<1x128xf32, #tpu.memory_space<vmem>>, vector<1x128xf32>
      %14 = vector.broadcast %13 : vector<1x128xf32> to vector<8x128xf32>
      %15 = arith.addf %12, %14 : vector<8x128xf32>
      %c0_14 = arith.constant 0 : index
      %c0_15 = arith.constant 0 : index
      %16 = vector.load %arg6[%c0_14, %c0_15] : memref<8x128xf32, #tpu.memory_space<vmem>>, vector<8x128xf32>
      tpu.vector_store %arg6[%c0_14, %c0_15], %15 {strides = array<i32>} : memref<8x128xf32, #tpu.memory_space<vmem>>, vector<8x128xf32>,
    } else {
    }
    return
  }
  func.func @transform_0(%arg0: i32, %arg1: i32, %arg2: i32) -> (i32, i32) {
    %c0_i32 = arith.constant 0 : i32
    return %arg0, %arg2 : i32, i32
  }
  func.func @transform_1(%arg0: i32, %arg1: i32, %arg2: i32) -> (i32, i32) {
    %c0_i32 = arith.constant 0 : i32
    return %arg2, %arg1 : i32, i32
  }
  func.func @transform_2(%arg0: i32, %arg1: i32, %arg2: i32) -> (i32, i32) {
    %c0_i32 = arith.constant 0 : i32
    %c0_i32_0 = arith.constant 0 : i32
    return %c0_i32, %arg1 : i32, i32
  }
  func.func @transform_3(%arg0: i32, %arg1: i32, %arg2: i32) -> (i32, i32) {
    %c0_i32 = arith.constant 0 : i32
    return %arg0, %arg1 : i32, i32
  }
}

</mosaic_0001>

<bundles_post_ra>
// kernel: tpu_custom_call.1
= control target key start
LH: loop header
LB: loop body
LE: loop exit
PB: predicated region body
PF: predicated region fallthrough
CT: control target
= control target key end

     0   :  { %8 = vsyncpa [#allocation3], 0  ;;  %s382_s0 = inlined_call_operand.hbm [shape: bf16[8,128], index: 0, kind: input, shape index: {}]   ;;  %s383_s1 = inlined_call_operand.hbm [shape: bf16[128,128], index: 1, kind: input, shape index: {}]   ;;  %s384_s2 = inlined_call_operand.vmem [shape: f32[1,128], index: 2, kind: input, shape index: {}]   ;;  %s385_s3 = inlined_call_operand.hbm [shape: f32[8,128], index: 3, kind: output, shape index: {}]  }
   0x1   :  { %9 = vsyncpa [#allocation6], 0 }
   0x2   :  { %10 = vsyncpa [#allocation4], 0  ;;  %s309_s12 = smov [#allocation2]   ;;  %s310_s14 = smov [#allocation5]  }
   0x3   :  { %s17_s13 = sshll.u32 %s309_s12, 4  ;;  %s26_s15 = sshll.u32 %s310_s14, 4  ;;  %s18_s13 = int_to_ptr.vmem [resolvable:$true] %s17_s13  ;;  %s336_s15 = int_to_ptr.vmem [resolvable:$true] %s26_s15 }
   0x4   :  { %s237_s18 = scalar_lea.hbm %s382_s0, 64 }
   0x5   :  { %p238_p0 = scmp.ne.s32.totalorder %s382_s0, %s237_s18  ;;  %p241_p1 = scmp.lt.u32.totalorder %s237_s18, %s382_s0 }
   0x7   :  { %p243_p2 = pnand %p241_p1, %p238_p0 }
   0x9   :  { %246 = shalt.err (!%p243_p2)
}
   0xa   :  { %s247_s23 = scalar_lea.vmem %s18_s13, 64  ;;  %p252_p4 = scmp.lt.s32.totalorder %s18_s13, %s18_s13 }
   0xb   :  { %p248_p3 = scmp.ne.s32.totalorder %s18_s13, %s247_s23  ;;  %p253_p5 = scmp.lt.s32.totalorder %s247_s23, %s247_s23 }
   0xd   :  { %p254_p6 = por %p253_p5, %p252_p4 }
   0xf   :  { %p255_p7 = pnand %p254_p6, %p248_p3 }
  0x11   :  { %258 = shalt.err (!%p255_p7)
}
  0x12   :  { %20 = dma.hbm_to_vmem [thread:$0]  %s382_s0, 64, %s18_s13, [#allocation3]  }
  0x13   :  { %s259_s28 = scalar_lea.hbm %s383_s1, 1024 }
  0x14   :  { %p260_p8 = scmp.ne.s32.totalorder %s383_s1, %s259_s28  ;;  %p263_p9 = scmp.lt.u32.totalorder %s259_s28, %s383_s1 }
  0x16   :  { %p265_p10 = pnand %p263_p9, %p260_p8 }
  0x18   :  { %268 = shalt.err (!%p265_p10)
}
  0x19   :  { %s269_s6 = scalar_lea.vmem %s336_s15, 1024  ;;  %p274_p12 = scmp.lt.s32.totalorder %s336_s15, %s336_s15 }
  0x1a   :  { %p270_p11 = scmp.ne.s32.totalorder %s336_s15, %s269_s6  ;;  %p275_p13 = scmp.lt.s32.totalorder %s269_s6, %s269_s6 }
  0x1c   :  { %p276_p0 = por %p275_p13, %p274_p12 }
  0x1e   :  { %p277_p1 = pnand %p276_p0, %p270_p11 }
  0x20   :  { %280 = shalt.err (!%p277_p1)
}
  0x21   :  { %s311_s0 = smov 64   ;;  %s312_s7 = smov 4  }
  0x22   :  { %32 = dma.hbm_to_vmem [thread:$0]  %s383_s1, 1024, %s336_s15, [#allocation6], %s311_s0, %s311_s0, %s312_s7  }
  0x23   :  { %303 = dma.done.wait [#allocation3], 64  }
  0x24   :  { %304 = vsyncadd [#allocation3], 4294967232 }
  0x25   :  { %305 = dma.done.wait [#allocation6], 1024  }
  0x26   :  { %306 = vsyncadd [#allocation6], 4294966272  ;;  %v313_v0 = vmov 0.0   ;;  %vm314_vm0 = vmmov 0   ;;  %v229_v1 = vld [vmem:[#allocation5] sm:$0xff]   ;;  %v230_v2 = vld [vmem:[#allocation5 + $0x8] sm:$0xff]  }
  0x27   :  { %202 = vmatprep.subr.bf16.mxu0 %v313_v0  ;;  %218 = vmatprep.mubr.msk.bf16.mxu0 %vm314_vm0, %v313_v0  ;;  %v231_v3 = vld [vmem:[#allocation5 + $0x10] sm:$0xff]   ;;  %v232_v4 = vld [vmem:[#allocation5 + $0x18] sm:$0xff]   ;;  %v233_v5 = vld [vmem:[#allocation5 + $0x20] sm:$0xff]   ;;  %s315_s11 = smov [#allocation7]  }
  0x28   :  { %203 = vmatpush3.bf16.msra.mxu0 %v229_v1  ;;  %v234_v6 = vld [vmem:[#allocation5 + $0x28] sm:$0xff]   ;;  %v235_v7 = vld [vmem:[#allocation5 + $0x30] sm:$0xff]   ;;  %v236_v8 = vld [vmem:[#allocation5 + $0x38] sm:$0xff]   ;;  %s174_s12 = sshll.u32 %s315_s11, 4  ;;  %s175_s12 = int_to_ptr.vmem [resolvable:$true] %s174_s12 }
  0x29   :  { %204 = vmatprep.subr.bf16.mxu0 %v313_v0  ;;  %v48_v9 = vld [vmem:[#allocation2] sm:$0xf]  ;;  %s281_s13 = scalar_lea.vmem %s175_s12, 128  ;;  %p286_p3 = scmp.lt.s32.totalorder %s175_s12, %s175_s12 }
  0x2a   :  { %v192_v11 = vld [vmem:[%s384_s2] ss:$0 sm:$0xff]  ;;  %p282_p2 = scmp.ne.s32.totalorder %s175_s12, %s281_s13  ;;  %p287_p4 = scmp.lt.s32.totalorder %s281_s13, %s281_s13 }
  0x2c   :  { %205 = vmatpush3.bf16.msra.mxu0 %v230_v2  ;;  %p288_p5 = por %p287_p4, %p286_p3 }
  0x2d   :  { %206 = vmatprep.subr.bf16.mxu0 %v313_v0 }
  0x2e   :  { %p289_p6 = pnand %p288_p5, %p282_p2 }
  0x30   :  { %207 = vmatpush3.bf16.msra.mxu0 %v231_v3 }
  0x31   :  { %208 = vmatprep.subr.bf16.mxu0 %v313_v0 }
  0x34   :  { %209 = vmatpush3.bf16.msra.mxu0 %v232_v4 }
  0x35   :  { %210 = vmatprep.subr.bf16.mxu0 %v313_v0 }
  0x38   :  { %211 = vmatpush3.bf16.msra.mxu0 %v233_v5 }
  0x39   :  { %212 = vmatprep.subr.bf16.mxu0 %v313_v0 }
  0x3c   :  { %213 = vmatpush3.bf16.msra.mxu0 %v234_v6 }
  0x3d   :  { %214 = vmatprep.subr.bf16.mxu0 %v313_v0 }
  0x40   :  { %215 = vmatpush3.bf16.msra.mxu0 %v235_v7 }
  0x41   :  { %216 = vmatprep.subr.bf16.mxu0 %v313_v0 }
  0x44   :  { %217 = vmatpush3.bf16.msra.mxu0 %v236_v8 }
  0x47   :  { %219 = vmatmul.mubr.bf16.vlgmr.msra.gmra.mrb[0].mxu0 %v48_v9 }
 0x11a   :  { %v147_v10 = vpop.f32.mrb[0].mxu0 }
 0x11b   :  { %v220_v12 = vpop.f32.mrb[1].mxu0  ;;  %v166_v15 = vadd.f32 %v192_v11, %v147_v10 }
 0x11c   :  { %v150_v13 = vpop.f32.mrb[2].mxu0 }
 0x11d   :  { %v221_v14 = vpop.f32.mrb[3].mxu0  ;;  %167 = vst [vmem:[#allocation7] sm:$0xff] %v166_v15 }
 0x11e   :  { %292 = shalt.err (!%p289_p6)
}
 0x11f   :  { %s293_s16 = scalar_lea.hbm %s385_s3, 128 }
 0x120   :  { %p294_p7 = scmp.ne.s32.totalorder %s385_s3, %s293_s16  ;;  %p297_p8 = scmp.lt.u32.totalorder %s293_s16, %s385_s3 }
 0x122   :  { %p299_p9 = pnand %p297_p8, %p294_p7 }
 0x124   :  { %302 = shalt.err (!%p299_p9)
}
 0x125   :  { %177 = dma.vmem_to_hbm [thread:$0]  %s175_s12, 128, %s385_s3, [#allocation4]  }
 0x126   :  { %307 = dma.done.wait [#allocation4], 128  }
 0x127   :  { %308 = vsyncadd [#allocation4], 4294967168 }
 0x128   :  { %181 = vsyncpa [#allocation3], 1 }
 0x129   :  { %182 = vsyncpa [#allocation6], 1 }
 0x12a   :  { %183 = vsyncpa [#allocation4], 1 }

</bundles_post_ra>
